<compile_context>
chip_gen: v6e
topology: v6e:2x2x1
jax: 0.10.0
libtpu: 0.0.40
codegen_flags: <defaults>
</compile_context>

<pallas_src>
import functools

import jax
import jax.numpy as jnp
from jax.experimental import pallas as pl
from jax.experimental.pallas import tpu as pltpu

MARGIN = 10.0

_LANES = 512      # lane-dense last dim -> big unmasked vector loads / DMAs
_ROW_ALIGN = 32   # row multiple that is a legal tile for f32 / bf16 / int8


def _cdiv(a, b):
    return -(-a // b)


def _round_up(x, m):
    return _cdiv(x, m) * m


def _contrastive_loss_kernel(d_ref, t_ref, out_ref, acc_ref, *, margin):
    j = pl.program_id(1)

    @pl.when(j == 0)
    def _():
        acc_ref[...] = jnp.zeros_like(acc_ref)

    d = d_ref[...].astype(jnp.float32)
    t = t_ref[...].astype(jnp.float32)

    # t*d^2 + (1-t)*relu(m-d)^2  ==  rr + t*(dd - rr)
    dd = d * d
    r = jnp.maximum(jnp.float32(margin) - d, 0.0)
    rr = r * r
    per_elem = rr + t * (dd - rr)

    # Element-wise VPU accumulate; no XLU / scalar-path work in the hot loop.
    acc_ref[...] += per_elem

    @pl.when(j == pl.num_programs(1) - 1)
    def _():
        # Single full reduction per split, done once.
        out_ref[0, 0] = jnp.sum(acc_ref[...])


def contrastive_loss2(distances, targets, *, margin=MARGIN,
                      block_elems=1 << 20, num_splits=2):
    """Scalar f32 contrastive loss. `distances`/`targets`: same shape, any rank.

    `targets` may be int8/bool/bf16/f32; narrower dtypes save HBM bandwidth.
    """
    n = distances.size
    d = distances.reshape(-1)
    t = targets.reshape(-1)

    rows_needed = _cdiv(n, _LANES)
    max_block_rows = max(block_elems // _LANES, _ROW_ALIGN)

    rows_per_split = _cdiv(rows_needed, num_splits)
    if rows_per_split < _ROW_ALIGN:
        # Too small to usefully shard across TensorCores.
        num_splits = 1
        rows_per_split = rows_needed

    # Two-stage block choice: number of blocks from the max block size, then
    # shrink the block so the grid covers the input with minimal padding.
    blocks_per_split = max(_cdiv(rows_per_split, max_block_rows), 1)
    block_rows = _round_up(_cdiv(rows_per_split, blocks_per_split), _ROW_ALIGN)
    rows = num_splits * blocks_per_split * block_rows

    pad = rows * _LANES - n
    if pad:
        # Padding contributes exactly zero: t=1, d=0 -> rr + 1*(0 - rr) == 0.
        d = jnp.concatenate([d, jnp.zeros((pad,), d.dtype)])
        t = jnp.concatenate([t, jnp.ones((pad,), t.dtype)])
    d2 = d.reshape(rows, _LANES)
    t2 = t.reshape(rows, _LANES)

    grid = (num_splits, blocks_per_split)

    def in_idx(c, j):
        return (c * blocks_per_split + j, 0)

    kernel = functools.partial(_contrastive_loss_kernel, margin=float(margin))

    bytes_accessed = (rows * _LANES * (d2.dtype.itemsize + t2.dtype.itemsize)
                      + num_splits * 4)
    cost = pl.CostEstimate(flops=8 * rows * _LANES, transcendentals=0,
                           bytes_accessed=bytes_accessed)

    partials = pl.pallas_call(
        kernel,
        out_shape=jax.ShapeDtypeStruct((num_splits, 1), jnp.float32),
        grid_spec=pltpu.PrefetchScalarGridSpec(
            num_scalar_prefetch=0,
            grid=grid,
            in_specs=[
                pl.BlockSpec((block_rows, _LANES), in_idx),
                pl.BlockSpec((block_rows, _LANES), in_idx),
            ],
            out_specs=pl.BlockSpec(
                (1, 1), lambda c, j: (c, 0), memory_space=pltpu.SMEM
            ),
            scratch_shapes=[pltpu.VMEM((block_rows, _LANES), jnp.float32)],
        ),
        compiler_params=pltpu.CompilerParams(
            dimension_semantics=("parallel", "arbitrary"),
            # Worst case (f32 targets): 2x(4 MiB d) + 2x(4 MiB t) + 4 MiB acc
            # = ~20 MiB; explicit limit keeps this legal on every chip
            # (v5e default scoped limit is only 16 MiB).
            vmem_limit_bytes=32 * 1024 * 1024,
        ),
        cost_estimate=cost,
    )(d2, t2)

    # 'mean' reduction over the true (unpadded) element count.
    # ('sum'/'none' applied to the already-scalar mean give the same value.)
    return jnp.sum(partials) * jnp.float32(1.0 / n)


def _reference(distances, targets, margin=MARGIN):
    d = distances.astype(jnp.float32)
    t = targets.astype(jnp.float32)
    return jnp.mean(t * d * d
                    + (1.0 - t) * jnp.square(jnp.maximum(margin - d, 0.0)))


if __name__ == "__main__":
    key = jax.random.PRNGKey(0)
    k1, k2 = jax.random.split(key)

    # Small "pairwise distances" layout: 16 rows x 128 distances.
    rows, lanes = 16, 128
    distances = jax.random.uniform(k1, (rows, lanes), jnp.float32) * 12.0
    # int8 targets: a quarter of the HBM traffic of f32 labels.
    targets = jax.random.bernoulli(k2, 0.5, (rows, lanes)).astype(jnp.int8)

    loss = contrastive_loss2(distances, targets)
    jax.block_until_ready(loss)

    ref = _reference(distances, targets)
    assert jnp.allclose(loss, ref, rtol=1e-5, atol=1e-5), (loss, ref)

    print("KERNEL_OK")
</pallas_src>

<mosaic_0001>
module attributes {stable_mosaic.version = 11 : i64} {
  func.func @_contrastive_loss_kernel(%arg0: i32, %arg1: i32, %arg2: memref<32x512xf32, #tpu.memory_space<vmem>>, %arg3: memref<32x512xi8, #tpu.memory_space<vmem>>, %arg4: memref<1x1xf32, #tpu.memory_space<smem>>, %arg5: memref<32x512xf32, #tpu.memory_space<vmem>>) attributes {dimension_semantics = [#tpu.dimension_semantics<parallel>, #tpu.dimension_semantics<arbitrary>], iteration_bounds = array<i64: 1, 1>, scalar_prefetch = 0 : i64, scratch_operands = 1 : i64, tpu.core_type = #tpu.core_type<tc>, window_params = [{transform_indices = @transform_0, window_bounds = array<i64: 32, 512>}, {transform_indices = @transform_1, window_bounds = array<i64: 32, 512>}, {transform_indices = @transform_2, window_bounds = array<i64: 1, 1>}]} {
    %c0_i32 = arith.constant 0 : i32
    %0 = arith.cmpi eq, %arg1, %c0_i32 : i32
    %1 = arith.extui %0 : i1 to i32
    %c0_i32_0 = arith.constant 0 : i32
    %2 = arith.cmpi ne, %1, %c0_i32_0 : i32
    scf.if %2 {
      %cst_11 = arith.constant 0.000000e+00 : f32
      %21 = vector.broadcast %cst_11 : f32 to vector<32x512xf32>
      %c0_12 = arith.constant 0 : index
      %c0_13 = arith.constant 0 : index
      %22 = vector.load %arg5[%c0_12, %c0_13] : memref<32x512xf32, #tpu.memory_space<vmem>>, vector<32x512xf32>
      tpu.vector_store %arg5[%c0_12, %c0_13], %21 {strides = array<i32>} : memref<32x512xf32, #tpu.memory_space<vmem>>, vector<32x512xf32>,
    } else {
    }
    %c0 = arith.constant 0 : index
    %c0_1 = arith.constant 0 : index
    %3 = vector.load %arg2[%c0, %c0_1] : memref<32x512xf32, #tpu.memory_space<vmem>>, vector<32x512xf32>
    %c0_2 = arith.constant 0 : index
    %c0_3 = arith.constant 0 : index
    %4 = vector.load %arg3[%c0_2, %c0_3] : memref<32x512xi8, #tpu.memory_space<vmem>>, vector<32x512xi8>
    %5 = arith.sitofp %4 : vector<32x512xi8> to vector<32x512xf32>
    %6 = arith.mulf %3, %3 : vector<32x512xf32>
    %cst = arith.constant 1.000000e+01 : f32
    %7 = vector.broadcast %cst : f32 to vector<32x512xf32>
    %8 = arith.subf %7, %3 : vector<32x512xf32>
    %cst_4 = arith.constant 0.000000e+00 : f32
    %9 = vector.broadcast %cst_4 : f32 to vector<32x512xf32>
    %10 = arith.maximumf %8, %9 : vector<32x512xf32>
    %11 = arith.mulf %10, %10 : vector<32x512xf32>
    %12 = arith.subf %6, %11 : vector<32x512xf32>
    %13 = arith.mulf %5, %12 : vector<32x512xf32>
    %14 = arith.addf %11, %13 : vector<32x512xf32>
    %c0_5 = arith.constant 0 : index
    %c0_6 = arith.constant 0 : index
    %15 = vector.load %arg5[%c0_5, %c0_6] : memref<32x512xf32, #tpu.memory_space<vmem>>, vector<32x512xf32>
    %16 = arith.addf %15, %14 : vector<32x512xf32>
    %c0_7 = arith.constant 0 : index
    %c0_8 = arith.constant 0 : index
    %17 = vector.load %arg5[%c0_7, %c0_8] : memref<32x512xf32, #tpu.memory_space<vmem>>, vector<32x512xf32>
    tpu.vector_store %arg5[%c0_7, %c0_8], %16 {strides = array<i32>} : memref<32x512xf32, #tpu.memory_space<vmem>>, vector<32x512xf32>,
    %c0_i32_9 = arith.constant 0 : i32
    %18 = arith.cmpi eq, %arg1, %c0_i32_9 : i32
    %19 = arith.extui %18 : i1 to i32
    %c0_i32_10 = arith.constant 0 : i32
    %20 = arith.cmpi ne, %19, %c0_i32_10 : i32
    scf.if %20 {
      %c0_11 = arith.constant 0 : index
      %c0_12 = arith.constant 0 : index
      %21 = vector.load %arg5[%c0_11, %c0_12] : memref<32x512xf32, #tpu.memory_space<vmem>>, vector<32x512xf32>
      %22 = vector.shape_cast %21 : vector<32x512xf32> to vector<1x32x512xf32>
      %cst_13 = arith.constant dense<0.000000e+00> : vector<1xf32>
      %23 = vector.multi_reduction <add>, %22, %cst_13 [1, 2] : vector<1x32x512xf32> to vector<1xf32>
      %24 = vector.shape_cast %23 : vector<1xf32> to vector<1x1x1xf32>
      %25 = vector.extract %24[0, 0, 0] : f32 from vector<1x1x1xf32>
      %c0_14 = arith.constant 0 : index
      %c0_15 = arith.constant 0 : index
      %26 = memref.load %arg4[%c0_14, %c0_15] : memref<1x1xf32, #tpu.memory_space<smem>>
      memref.store %25, %arg4[%c0_14, %c0_15] : memref<1x1xf32, #tpu.memory_space<smem>>
    } else {
    }
    return
  }
  func.func @transform_0(%arg0: i32, %arg1: i32) -> (i32, i32) {
    %c1_i32 = arith.constant 1 : i32
    %0 = arith.muli %arg0, %c1_i32 : i32
    %1 = arith.addi %0, %arg1 : i32
    %c0_i32 = arith.constant 0 : i32
    %c0_i32_0 = arith.constant 0 : i32
    return %1, %c0_i32 : i32, i32
  }
  func.func @transform_1(%arg0: i32, %arg1: i32) -> (i32, i32) {
    %c1_i32 = arith.constant 1 : i32
    %0 = arith.muli %arg0, %c1_i32 : i32
    %1 = arith.addi %0, %arg1 : i32
    %c0_i32 = arith.constant 0 : i32
    %c0_i32_0 = arith.constant 0 : i32
    return %1, %c0_i32 : i32, i32
  }
  func.func @transform_2(%arg0: i32, %arg1: i32) -> (i32, i32) {
    %c0_i32 = arith.constant 0 : i32
    %c0_i32_0 = arith.constant 0 : i32
    return %arg0, %c0_i32 : i32, i32
  }
}

</mosaic_0001>

<bundles_post_ra>
// kernel: tpu_custom_call.1
= control target key start
LH: loop header
LB: loop body
LE: loop exit
PB: predicated region body
PF: predicated region fallthrough
CT: control target
= control target key end

     0   :  { %7 = vsyncpa [#allocation4], 0  ;;  %s518_s0 = inlined_call_operand.hbm [shape: f32[32,512], index: 0, kind: input, shape index: {}]   ;;  %s519_s1 = inlined_call_operand.hbm [shape: s8[32,512], index: 1, kind: input, shape index: {}]   ;;  %s520_s2 = inlined_call_operand.hbm [shape: f32[1,1], index: 2, kind: output, shape index: {}]  }
   0x1   :  { %8 = vsyncpa [#allocation7], 0 }
   0x2   :  { %9 = vsyncpa [#allocation5], 0  ;;  %s403_s9 = smov [#allocation3]  }
   0x3   :  { %s20_s10 = sshll.u32 %s403_s9, 4  ;;  %s21_s10 = int_to_ptr.vmem [resolvable:$true] %s20_s10 }
   0x4   :  { %s357_s11 = scalar_lea.vmem %s21_s10, 2048  ;;  %p362_p1 = scmp.lt.s32.totalorder %s21_s10, %s21_s10 }
   0x5   :  { %p358_p0 = scmp.ne.s32.totalorder %s21_s10, %s357_s11  ;;  %p363_p2 = scmp.lt.s32.totalorder %s357_s11, %s357_s11 }
   0x7   :  { %p364_p3 = por %p363_p2, %p362_p1 }
   0x9   :  { %p365_p4 = pnand %p364_p3, %p358_p0 }
   0xb   :  { %368 = shalt.err (!%p365_p4)
}
   0xc   :  { %s404_s12 = smov 512   ;;  %s405_s13 = smov 32  }
   0xd   :  { %26 = dma.hbm_to_vmem [thread:$0]  %s518_s0, 2048, %s21_s10, [#allocation4], %s404_s12, %s404_s12, %s405_s13  }
   0xe   :  { %s406_s16 = smov [#allocation6]  }
   0xf   :  { %s37_s17 = sshll.u32 %s406_s16, 4  ;;  %s38_s17 = int_to_ptr.vmem [resolvable:$true] %s37_s17 }
  0x10   :  { %s377_s18 = scalar_lea.vmem %s38_s17, 512  ;;  %p382_p6 = scmp.lt.s32.totalorder %s38_s17, %s38_s17 }
  0x11   :  { %p378_p5 = scmp.ne.s32.totalorder %s38_s17, %s377_s18  ;;  %p383_p7 = scmp.lt.s32.totalorder %s377_s18, %s377_s18 }
  0x13   :  { %p384_p8 = por %p383_p7, %p382_p6 }
  0x15   :  { %p385_p9 = pnand %p384_p8, %p378_p5 }
  0x17   :  { %388 = shalt.err (!%p385_p9)
}
  0x18   :  { %40 = dma.hbm_to_vmem [thread:$0]  %s519_s1, 512, %s38_s17, [#allocation7]  }
  0x19   :  { %397 = dma.done.wait [#allocation4], 2048  }
  0x1a   :  { %398 = vsyncadd [#allocation4], 4294965248 }
  0x1b   :  { %399 = dma.done.wait [#allocation7], 512  }
  0x1c   :  { %400 = vsyncadd [#allocation7], 4294966784  ;;  %v70_v0 = vld [vmem:[#allocation3] sm:$0xff]  ;;  %v71_v1 = vld [vmem:[#allocation3 + $0x8] sm:$0xff]  ;;  %s407_s1 = smov [#allocation8]  }
  0x1d   :  { %v72_v2 = vld [vmem:[#allocation3 + $0x10] sm:$0xff]  ;;  %v138_v3 = vsub.f32 10.0, %v70_v0  ;;  %v139_v4 = vsub.f32 10.0, %v71_v1  ;;  %v73_v5 = vld [vmem:[#allocation3 + $0x18] sm:$0xff]  ;;  %v74_v7 = vld [vmem:[#allocation3 + $0x20] sm:$0xff]  ;;  %v429_v9 = vmul.f32 %v70_v0, %v70_v0  ;;  %v431_v10 = vmul.f32 %v71_v1, %v71_v1 }
  0x1e   :  { %v140_v6 = vsub.f32 10.0, %v72_v2  ;;  %v75_v8 = vld [vmem:[#allocation3 + $0x28] sm:$0xff]  ;;  %v76_v11 = vld [vmem:[#allocation3 + $0x30] sm:$0xff]  ;;  %v433_v12 = vld [vmem:[#allocation6] sm:$0xff]  ;;  %v437_v14 = vmul.f32 %v72_v2, %v72_v2  ;;  %v141_v15 = vsub.f32 10.0, %v73_v5  ;;  %v439_v20 = vmul.f32 %v73_v5, %v73_v5 }
  0x1f   :  { %v435_v13 = vld [vmem:[#allocation6 + $0x8] sm:$0xff]  ;;  %v154_v16 = vmax.f32 %v138_v3, 0.0  ;;  %v155_v17 = vmax.f32 %v139_v4, 0.0  ;;  %v77_v18 = vld [vmem:[#allocation3 + $0x38] sm:$0xff]  ;;  %v78_v19 = vld [vmem:[#allocation3 + $0x40] sm:$0xff]  ;;  %v441_v21 = vmul.f32 %v74_v7, %v74_v7  ;;  %v443_v22 = vmul.f32 %v75_v8, %v75_v8 }
  0x20   :  { %v445_v23 = vmul.f32 %v76_v11, %v76_v11  ;;  %v79_v24 = vld [vmem:[#allocation3 + $0x48] sm:$0xff]  ;;  %v447_v25 = vld [vmem:[#allocation3 + $0x50] sm:$0xff]  ;;  %v451_v27 = vmul.f32 %v77_v18, %v77_v18  ;;  %v453_v28 = vmul.f32 %v78_v19, %v78_v19  ;;  %v142_v29 = vsub.f32 10.0, %v74_v7  ;;  %v455_v31 = vld [vmem:[#allocation3 + $0x58] sm:$0xff] }
  0x21   :  { %v449_v26 = vld [vmem:[#allocation6 + $0x10] sm:$0xff]  ;;  %v156_v30 = vmax.f32 %v140_v6, 0.0  ;;  %v90_v32 = vunpack.c.0.s8 %v433_v12  ;;  %v91_v33 = vunpack.c.0.s8 %v435_v13  ;;  %v459_v34 = vmul.f32 %v79_v24, %v79_v24  ;;  %v465_v36 = vld [vmem:[#allocation3 + $0x60] sm:$0xff]  ;;  %v467_v37 = vld [vmem:[#allocation3 + $0x68] sm:$0xff] }
  0x22   :  { %v463_v35 = vmul.f32 %v447_v25, %v447_v25  ;;  %v469_v38 = vld [vmem:[#allocation6 + $0x18] sm:$0xff]  ;;  %v143_v39 = vsub.f32 10.0, %v75_v8  ;;  %v157_v40 = vmax.f32 %v141_v15, 0.0  ;;  %v170_v41 = vmul.f32 %v154_v16, %v154_v16 }
  0x23   :  { %v171_v42 = vmul.f32 %v155_v17, %v155_v17  ;;  %v92_v43 = vunpack.c.0.s8 %v449_v26  ;;  %v474_v44 = vmul.f32 %v455_v31, %v455_v31  ;;  %v478_v45 = vmul.f32 %v465_v36, %v465_v36 }
  0x24   :  { %v482_v46 = vmul.f32 %v467_v37, %v467_v37  ;;  %v94_v47 = vunpack.c.1.s8 %v433_v12  ;;  %v144_v48 = vsub.f32 10.0, %v76_v11  ;;  %v158_v49 = vmax.f32 %v142_v29, 0.0 }
  0x25   :  { %v172_v50 = vmul.f32 %v156_v30, %v156_v30  ;;  %v93_v51 = vunpack.c.0.s8 %v469_v38  ;;  %v106_v52 = vcvt.s32.f32 %v90_v32  ;;  %v107_v53 = vcvt.s32.f32 %v91_v33 }
  0x26   :  { %v145_v54 = vsub.f32 10.0, %v77_v18  ;;  %v159_v55 = vmax.f32 %v143_v39, 0.0  ;;  %v173_v56 = vmul.f32 %v157_v40, %v157_v40  ;;  %v186_v57 = vsub.f32 %v429_v9, %v170_v41 }
  0x27   :  { %v187_v58 = vsub.f32 %v431_v10, %v171_v42  ;;  %v95_v59 = vunpack.c.1.s8 %v435_v13  ;;  %v96_v60 = vunpack.c.1.s8 %v449_v26  ;;  %v97_v61 = vunpack.c.1.s8 %v469_v38 }
  0x28   :  { %v108_v62 = vcvt.s32.f32 %v92_v43  ;;  %v146_v63 = vsub.f32 10.0, %v78_v19  ;;  %v160_v0 = vmax.f32 %v144_v48, 0.0  ;;  %v174_v1 = vmul.f32 %v158_v49, %v158_v49 }
  0x29   :  { %v188_v2 = vsub.f32 %v437_v14, %v172_v50  ;;  %v98_v3 = vunpack.c.2.s8 %v433_v12  ;;  %v109_v4 = vcvt.s32.f32 %v93_v51  ;;  %v147_v5 = vsub.f32 10.0, %v79_v24  ;;  %v84_v51 = vld [vmem:[#allocation3 + $0x70] sm:$0xff] }
  0x2a   :  { %v161_v6 = vmax.f32 %v145_v54, 0.0  ;;  %v175_v7 = vmul.f32 %v159_v55, %v159_v55  ;;  %v189_v8 = vsub.f32 %v439_v20, %v173_v56  ;;  %v202_v9 = vmul.f32 %v186_v57, %v106_v52 }
  0x2b   :  { %v203_v10 = vmul.f32 %v187_v58, %v107_v53  ;;  %v99_v11 = vunpack.c.2.s8 %v435_v13  ;;  %v100_v15 = vunpack.c.2.s8 %v449_v26  ;;  %v110_v16 = vcvt.s32.f32 %v94_v47  ;;  %v85_v58 = vld [vmem:[#allocation3 + $0x78] sm:$0xff] }
  0x2c   :  { %v148_v17 = vsub.f32 10.0, %v447_v25  ;;  %v162_v18 = vmax.f32 %v146_v63, 0.0  ;;  %v176_v19 = vmul.f32 %v160_v0, %v160_v0  ;;  %v190_v14 = vsub.f32 %v441_v21, %v174_v1 }
  0x2d   :  { %v204_v29 = vmul.f32 %v188_v2, %v108_v62  ;;  %v111_v30 = vcvt.s32.f32 %v95_v59  ;;  %v149_v24 = vsub.f32 10.0, %v455_v31  ;;  %v163_v32 = vmax.f32 %v147_v5, 0.0 }
  0x2e   :  { %v177_v33 = vmul.f32 %v161_v6, %v161_v6  ;;  %v191_v20 = vsub.f32 %v443_v22, %v175_v7  ;;  %v205_v39 = vmul.f32 %v189_v8, %v109_v4  ;;  %v218_v40 = vadd.f32 %v202_v9, %v170_v41 }
  0x2f   :  { %v219_v43 = vadd.f32 %v203_v10, %v171_v42  ;;  %v101_v48 = vunpack.c.2.s8 %v469_v38  ;;  %v112_v47 = vcvt.s32.f32 %v96_v60  ;;  %v150_v25 = vsub.f32 10.0, %v465_v36 }
  0x30   :  { %v164_v49 = vmax.f32 %v148_v17, 0.0  ;;  %v178_v52 = vmul.f32 %v162_v18, %v162_v18  ;;  %v192_v21 = vsub.f32 %v445_v23, %v176_v19  ;;  %v206_v53 = vmul.f32 %v190_v14, %v110_v16 }
  0x31   :  { %v220_v54 = vadd.f32 %v204_v29, %v172_v50  ;;  %v113_v31 = vcvt.s32.f32 %v97_v61  ;;  %v151_v55 = vsub.f32 10.0, %v467_v37  ;;  %v165_v57 = vmax.f32 %v149_v24, 0.0 }
  0x32   :  { %v179_v22 = vmul.f32 %v163_v32, %v163_v32  ;;  %v193_v41 = vsub.f32 %v451_v27, %v177_v33  ;;  %v207_v42 = vmul.f32 %v191_v20, %v111_v30  ;;  %v221_v59 = vadd.f32 %v205_v39, %v173_v56 }
  0x33   :  { %v301_v60 = vadd.f32 %v219_v43, %v218_v40  ;;  %v114_v62 = vcvt.s32.f32 %v98_v3  ;;  %v152_v36 = vsub.f32 10.0, %v84_v51  ;;  %v166_v63 = vmax.f32 %v150_v25, 0.0 }
  0x34   :  { %v180_v0 = vmul.f32 %v164_v49, %v164_v49  ;;  %v194_v2 = vsub.f32 %v453_v28, %v178_v52  ;;  %v208_v23 = vmul.f32 %v192_v21, %v112_v47  ;;  %v222_v4 = vadd.f32 %v206_v53, %v174_v1 }
  0x35   :  { %v302_v50 = vadd.f32 %v301_v60, %v220_v54  ;;  %v115_v61 = vcvt.s32.f32 %v99_v11  ;;  %v153_v5 = vsub.f32 10.0, %v85_v58  ;;  %v167_v37 = vmax.f32 %v151_v55, 0.0 }
  0x36   :  { %v181_v6 = vmul.f32 %v165_v57, %v165_v57  ;;  %v195_v8 = vsub.f32 %v459_v34, %v179_v22  ;;  %v209_v9 = vmul.f32 %v193_v41, %v113_v31  ;;  %v223_v27 = vadd.f32 %v207_v42, %v175_v7 }
  0x37   :  { %v303_v10 = vadd.f32 %v302_v50, %v221_v59  ;;  %v102_v56 = vunpack.c.3.s8 %v433_v12  ;;  %v116_v3 = vcvt.s32.f32 %v100_v15  ;;  %v168_v16 = vmax.f32 %v152_v36, 0.0 }
  0x38   :  { %v182_v17 = vmul.f32 %v166_v63, %v166_v63  ;;  %v196_v18 = vsub.f32 %v463_v35, %v180_v0  ;;  %v210_v28 = vmul.f32 %v194_v2, %v114_v62  ;;  %v224_v14 = vadd.f32 %v208_v23, %v176_v19 }
  0x39   :  { %v304_v1 = vadd.f32 %v303_v10, %v222_v4  ;;  %v103_v11 = vunpack.c.3.s8 %v435_v13  ;;  %v117_v29 = vcvt.s32.f32 %v101_v48  ;;  %v169_v30 = vmax.f32 %v153_v5, 0.0 }
  0x3a   :  { %v183_v24 = vmul.f32 %v167_v37, %v167_v37  ;;  %v197_v34 = vsub.f32 %v474_v44, %v181_v6  ;;  %v211_v32 = vmul.f32 %v195_v8, %v115_v61  ;;  %v225_v7 = vadd.f32 %v209_v9, %v177_v33 }
  0x3b   :  { %v305_v20 = vadd.f32 %v304_v1, %v223_v27  ;;  %v104_v12 = vunpack.c.3.s8 %v449_v26  ;;  %v118_v15 = vcvt.s32.f32 %v102_v56  ;;  %v136_v39 = vmul.f32 %v84_v51, %v84_v51 }
  0x3c   :  { %v184_v40 = vmul.f32 %v168_v16, %v168_v16  ;;  %v198_v35 = vsub.f32 %v478_v45, %v182_v17  ;;  %v212_v43 = vmul.f32 %v196_v18, %v116_v3  ;;  %v226_v19 = vadd.f32 %v210_v28, %v178_v52 }
  0x3d   :  { %v306_v47 = vadd.f32 %v305_v20, %v224_v14  ;;  %v105_v13 = vunpack.c.3.s8 %v469_v38  ;;  %v119_v48 = vcvt.s32.f32 %v103_v11  ;;  %v137_v25 = vmul.f32 %v85_v58, %v85_v58 }
  0x3e   :  { %v185_v49 = vmul.f32 %v169_v30, %v169_v30  ;;  %v199_v44 = vsub.f32 %v482_v46, %v183_v24  ;;  %v213_v21 = vmul.f32 %v197_v34, %v117_v29  ;;  %v227_v33 = vadd.f32 %v211_v32, %v179_v22 }
  0x3f   :  { %v307_v53 = vadd.f32 %v306_v47, %v225_v7  ;;  %v120_v54 = vcvt.s32.f32 %v104_v12  ;;  %v200_v26 = vsub.f32 %v136_v39, %v184_v40  ;;  %v214_v31 = vmul.f32 %v198_v35, %v118_v15 }
  0x40   :  { %v228_v51 = vadd.f32 %v212_v43, %v180_v0  ;;  %v121_v57 = vcvt.s32.f32 %v105_v13  ;;  %v201_v45 = vsub.f32 %v137_v25, %v185_v49  ;;  %v215_v41 = vmul.f32 %v199_v44, %v119_v48 }
  0x41   :  { %v308_v55 = vadd.f32 %v307_v53, %v226_v19  ;;  %v229_v52 = vadd.f32 %v213_v21, %v181_v6  ;;  %v216_v59 = vmul.f32 %v200_v26, %v120_v54  ;;  %v230_v38 = vadd.f32 %v214_v31, %v182_v17 }
  0x42   :  { %v217_v58 = vmul.f32 %v201_v45, %v121_v57  ;;  %v231_v62 = vadd.f32 %v215_v41, %v183_v24 }
  0x43   :  { %v309_v42 = vadd.f32 %v308_v55, %v227_v33  ;;  %v232_v46 = vadd.f32 %v216_v59, %v184_v40 }
  0x44   :  { %v233_v22 = vadd.f32 %v217_v58, %v185_v49 }
  0x45   :  { %v310_v60 = vadd.f32 %v309_v42, %v228_v51 }
  0x47   :  { %v311_v36 = vadd.f32 %v310_v60, %v229_v52 }
  0x49   :  { %v312_v63 = vadd.f32 %v311_v36, %v230_v38 }
  0x4b   :  { %v313_v2 = vadd.f32 %v312_v63, %v231_v62 }
  0x4d   :  { %v314_v23 = vadd.f32 %v313_v2, %v232_v46 }
  0x4f   :  { %v315_v4 = vadd.f32 %v314_v23, %v233_v22 }
  0x51   :  { %316 = vadd.xlane.f32.xlu0 %v315_v4 }
  0xda   :  { %v317_v0 = vpop.xlane.xlu0 %316 }
  0xdb   :  { %v318_v50 = vrot.slane %v317_v0, 4 }
  0xdd   :  { %v319_v61 = vadd.f32 %v318_v50, %v317_v0 }
  0xdf   :  { %v320_v5 = vrot.slane %v319_v61, 2 }
  0xe1   :  { %v321_v37 = vadd.f32 %v320_v5, %v319_v61 }
  0xe3   :  { %v322_v6 = vrot.slane %v321_v37, 1 }
  0xe5   :  { %v323_v8 = vadd.f32 %v322_v6, %v321_v37 }
  0xe7   :  { %342 = vpush %v323_v8 }
 0x118   :  { %s343_s0 = spop %342 }
 0x119   :  { %326 = sst [smem:[#allocation8]] %s343_s0 }
 0x11a   :  { %334 = dma.smem_to_hbm %s407_s1, 16, %s520_s2, [#allocation5]  }
 0x11b   :  { %401 = dma.done.wait [#allocation5], 16  }
 0x11c   :  { %402 = vsyncadd [#allocation5], 4294967280 }
 0x11d   :  { %338 = sfence }
 0x11e   :  { %339 = vsyncpa [#allocation4], 1 }
 0x11f   :  { %340 = vsyncpa [#allocation7], 1 }
 0x120   :  { %341 = vsyncpa [#allocation5], 1 }

</bundles_post_ra>
